<compile_context>
chip_gen: v5e
topology: v5e:2x2
jax: 0.10.0
libtpu: 0.0.40
codegen_flags: <defaults>
</compile_context>

<pallas_src>
import functools

import jax
import jax.numpy as jnp
from jax import lax
from jax.experimental import pallas as pl
from jax.experimental.pallas import tpu as pltpu

BN_EPS = 1e-5


def _round_up(x, m):
    return ((x + m - 1) // m) * m


def _cdiv(a, b):
    return -(-a // b)


def _root_kernel(*refs, num_children, residual, compute_dtype, precision):
    # refs = (x_0 .. x_{k-1}, w_0 .. w_{k-1}, shift, out)
    #   x_i   : (nb, C_i, tm)   child i, channels on sublanes, flat spatial on lanes
    #   w_i   : (Cout, C_i)     BN-scale-folded conv-weight slice for child i
    #   shift : (Cout, 1)       beta - running_mean * scale   (f32)
    #   out   : (nb, Cout, tm)
    x_refs = refs[:num_children]
    w_refs = refs[num_children:2 * num_children]
    shift = refs[2 * num_children][...]
    o_ref = refs[2 * num_children + 1]

    nb = o_ref.shape[0]
    for b in range(nb):  # static, small unroll — amortizes per-step overhead
        x0 = x_refs[0][b]
        acc = jnp.dot(w_refs[0][...], x0.astype(compute_dtype),
                      preferred_element_type=jnp.float32, precision=precision)
        for i in range(1, num_children):
            acc += jnp.dot(w_refs[i][...], x_refs[i][b].astype(compute_dtype),
                           preferred_element_type=jnp.float32, precision=precision)
        y = acc + shift  # per-channel BN shift, broadcast over lanes
        if residual:
            # children[0] tile is already resident in VMEM in its ORIGINAL dtype
            # (no extra HBM stream, no wrapper-side downcast of the skip path).
            y = y + x0.astype(jnp.float32)
        o_ref[b] = jnp.maximum(y, 0.0).astype(o_ref.dtype)


def root_forward(x_list, weight, gamma, beta, running_mean, running_var,
                 residual, *, compute_dtype=None, out_dtype=None,
                 precision=None, tm_max=2048, vmem_budget=32 << 20):
    """Forward of Root (eval mode).

    x_list : list of NCHW arrays (children).
    weight : (Cout, Cin, 1, 1) conv weight, Cin == sum of child channels.
    compute_dtype : matmul operand dtype.  None -> input dtype.  If it differs
        from the input dtype, the cast happens per-tile INSIDE the kernel (the
        HBM stream stays in the input dtype).
    out_dtype : output dtype (None -> input dtype); bf16 halves write traffic.
    precision : lax.Precision for the matmul (None -> DEFAULT; pass
        lax.Precision.HIGH for a tighter f32 path — HIGHEST is never needed).

    NOTE: eval-mode BatchNorm only — running stats are folded at trace time.
    """
    # TODO(synk): training-mode BatchNorm (batch stats / running-stat update) not implemented.
    n, _, h, w_sp = x_list[0].shape
    cout = weight.shape[0]
    c_list = [int(x.shape[1]) for x in x_list]
    cin = sum(c_list)
    assert weight.shape[1] == cin, "weight Cin must match concatenated channels"
    if residual:
        assert c_list[0] == cout, "residual requires children[0] channels == out_channels"

    x_dtype = x_list[0].dtype
    if compute_dtype is None:
        compute_dtype = x_dtype
    if out_dtype is None:
        out_dtype = x_dtype
    hw = h * w_sp

    # Fold eval-mode BatchNorm into the conv weight (scale) + per-channel shift.
    scale = gamma / jnp.sqrt(running_var + BN_EPS)                 # (Cout,)
    w2d = weight.reshape(cout, cin) * scale[:, None]               # (Cout, Cin), BN-scale folded
    shift = (beta - running_mean * scale).reshape(cout, 1).astype(jnp.float32)

    xin_bytes = jnp.dtype(x_dtype).itemsize
    out_bytes = jnp.dtype(out_dtype).itemsize
    w_bytes = jnp.dtype(compute_dtype).itemsize

    # ---- Lane tile: biggest multiple of 128 fitting the VMEM budget (mem-bound) ----
    tm = min(_round_up(tm_max, 128), _round_up(hw, 128))
    while tm > 128 and 2 * tm * (cin * xin_bytes + cout * out_bytes) > vmem_budget:
        tm -= 128
    tm = max(tm, 128)

    # ---- Batch block: make each grid step move a few hundred KiB (per-step ~0.35us) ----
    step_bytes_one = tm * (cin * xin_bytes + cout * out_bytes)
    nb_vmem_cap = max(1, vmem_budget // max(2 * step_bytes_one, 1))
    nb_target = min(16, max(1, _cdiv(512 << 10, step_bytes_one)))
    nb_max = min(n, nb_vmem_cap, nb_target)
    nb = 1
    for d in range(int(nb_max), 0, -1):        # largest divisor of n: no ragged batch blocks
        if n % d == 0:
            nb = d
            break

    # ---- Megacore guard: keep enough grid steps for 2-TC sharding (v7x) ----
    while nb > 1 and (n // nb) * _cdiv(hw, tm) < 4:
        nb -= 1
        while nb > 1 and n % nb:
            nb -= 1
    while (n // nb) * _cdiv(hw, tm) < 2 and tm > 128:
        tm -= 128

    grid = (n // nb, _cdiv(hw, tm))

    # NCHW -> (N, C, H*W): free reshape.  No pad, no concat, no wrapper-side cast.
    xs, offs, off = [], [], 0
    for x, c in zip(x_list, c_list):
        xs.append(x.reshape(n, c, hw))
        offs.append(off)
        off += c
    ws = [w2d[:, o:o + c].astype(compute_dtype) for o, c in zip(offs, c_list)]

    in_specs = []
    for c in c_list:
        in_specs.append(pl.BlockSpec((nb, c, tm), lambda b, m: (b, 0, m)))
    for c in c_list:
        in_specs.append(pl.BlockSpec((cout, c), lambda b, m: (0, 0)))
    in_specs.append(pl.BlockSpec((cout, 1), lambda b, m: (0, 0)))
    out_specs = pl.BlockSpec((nb, cout, tm), lambda b, m: (b, 0, m))

    # VMEM: double-buffered activation tiles + (small) weights/shift, capped at
    # 48 MiB so it stays comfortably inside v7x's 64 MiB physical VMEM.
    need = 2 * nb * step_bytes_one + 2 * cout * cin * w_bytes + 2 * cout * 4
    vmem_limit = int(min(48 << 20, max(need + (8 << 20), 32 << 20)))

    cost = pl.CostEstimate(
        flops=2 * n * hw * cin * cout,
        transcendentals=0,
        bytes_accessed=(n * hw * cin * xin_bytes + n * hw * cout * out_bytes
                        + cin * cout * w_bytes + cout * 4))

    out_flat = pl.pallas_call(
        functools.partial(_root_kernel, num_children=len(x_list),
                          residual=residual, compute_dtype=compute_dtype,
                          precision=precision),
        out_shape=jax.ShapeDtypeStruct((n, cout, hw), out_dtype),
        grid_spec=pltpu.PrefetchScalarGridSpec(
            num_scalar_prefetch=0,
            grid=grid,
            in_specs=in_specs,
            out_specs=out_specs,
        ),
        compiler_params=pltpu.CompilerParams(
            dimension_semantics=("parallel", "parallel"),
            vmem_limit_bytes=vmem_limit),
        cost_estimate=cost,
    )(*xs, *ws, shift)

    return out_flat.reshape(n, cout, h, w_sp)


def _reference(x_list, weight, gamma, beta, running_mean, running_var, residual):
    x = jnp.concatenate(x_list, axis=1)
    cout, cin = weight.shape[0], weight.shape[1]
    y = jnp.einsum('nchw,oc->nohw', x, weight.reshape(cout, cin),
                   precision=lax.Precision.HIGHEST)
    scale = gamma / jnp.sqrt(running_var + BN_EPS)
    shift = beta - running_mean * scale
    y = y * scale[None, :, None, None] + shift[None, :, None, None]
    if residual:
        y = y + x_list[0]
    return jnp.maximum(y, 0.0)


if __name__ == "__main__":
    key = jax.random.PRNGKey(0)
    k1, k2, k3, k4, k5, k6 = jax.random.split(key, 6)

    # Root(in_channels=16, out_channels=8, kernel_size=1, residual=True)
    batch, h, w_sp = 2, 16, 16
    c0 = 8            # children[0] channels == out_channels (needed for residual add)
    c1 = 8
    cin = c0 + c1     # 16
    cout = 8

    x0 = jax.random.normal(k1, (batch, c0, h, w_sp), jnp.float32)
    x1 = jax.random.normal(k2, (batch, c1, h, w_sp), jnp.float32)

    conv_w = jax.random.normal(k3, (cout, cin, 1, 1), jnp.float32) * 0.1
    gamma = 1.0 + 0.1 * jax.random.normal(k4, (cout,), jnp.float32)
    beta = 0.1 * jax.random.normal(k5, (cout,), jnp.float32)
    running_mean = 0.05 * jax.random.normal(k6, (cout,), jnp.float32)
    running_var = jnp.ones((cout,), jnp.float32)

    ref = _reference([x0, x1], conv_w, gamma, beta, running_mean, running_var,
                     residual=True)

    # f32 streams, f32 output (default MXU precision; pass lax.Precision.HIGH if
    # bit-closeness matters — HIGHEST is never needed for a 1x1 conv + BN).
    out_f32 = root_forward([x0, x1], conv_w, gamma, beta, running_mean,
                           running_var, residual=True)
    out_f32 = jax.block_until_ready(out_f32)
    assert out_f32.shape == (batch, cout, h, w_sp)
    assert jnp.allclose(out_f32, ref, atol=2e-2, rtol=2e-2), "f32 mismatch vs reference"

    # bf16 path: inputs already bf16 (as if the upstream producer emitted bf16,
    # so no standalone wrapper cast) and bf16 output to halve the write stream.
    x0_b = x0.astype(jnp.bfloat16)
    x1_b = x1.astype(jnp.bfloat16)
    out_bf16 = root_forward([x0_b, x1_b], conv_w, gamma, beta, running_mean,
                            running_var, residual=True,
                            out_dtype=jnp.bfloat16)
    out_bf16 = jax.block_until_ready(out_bf16)
    assert out_bf16.shape == (batch, cout, h, w_sp)
    assert out_bf16.dtype == jnp.bfloat16
    assert jnp.allclose(out_bf16.astype(jnp.float32), ref, atol=5e-2, rtol=5e-2), \
        "bf16 mismatch vs reference"

    print("KERNEL_OK")
</pallas_src>

<mosaic_0001>
module attributes {stable_mosaic.version = 11 : i64} {
  func.func @_root_kernel(%arg0: i32, %arg1: i32, %arg2: memref<1x8x256xf32, #tpu.memory_space<vmem>>, %arg3: memref<1x8x256xf32, #tpu.memory_space<vmem>>, %arg4: memref<8x8xf32, #tpu.memory_space<vmem>>, %arg5: memref<8x8xf32, #tpu.memory_space<vmem>>, %arg6: memref<8x1xf32, #tpu.memory_space<vmem>>, %arg7: memref<1x8x256xf32, #tpu.memory_space<vmem>>) attributes {dimension_semantics = [#tpu.dimension_semantics<parallel>, #tpu.dimension_semantics<parallel>], iteration_bounds = array<i64: 2, 1>, scalar_prefetch = 0 : i64, scratch_operands = 0 : i64, tpu.core_type = #tpu.core_type<tc>, window_params = [{transform_indices = @transform_0, window_bounds = array<i64: 1, 8, 256>}, {transform_indices = @transform_1, window_bounds = array<i64: 1, 8, 256>}, {pipeline_mode = #tpu.pipeline_mode<synchronous>, transform_indices = @transform_2, window_bounds = array<i64: 8, 8>}, {pipeline_mode = #tpu.pipeline_mode<synchronous>, transform_indices = @transform_3, window_bounds = array<i64: 8, 8>}, {pipeline_mode = #tpu.pipeline_mode<synchronous>, transform_indices = @transform_4, window_bounds = array<i64: 8, 1>}, {transform_indices = @transform_5, window_bounds = array<i64: 1, 8, 256>}]} {
    %c0 = arith.constant 0 : index
    %c0_0 = arith.constant 0 : index
    %0 = vector.load %arg6[%c0, %c0_0] : memref<8x1xf32, #tpu.memory_space<vmem>>, vector<8x1xf32>
    %c0_1 = arith.constant 0 : index
    %c0_2 = arith.constant 0 : index
    %c0_3 = arith.constant 0 : index
    %1 = vector.load %arg2[%c0_1, %c0_2, %c0_3] : memref<1x8x256xf32, #tpu.memory_space<vmem>>, vector<1x8x256xf32>
    %2 = vector.shape_cast %1 : vector<1x8x256xf32> to vector<8x256xf32>
    %c0_4 = arith.constant 0 : index
    %c0_5 = arith.constant 0 : index
    %3 = vector.load %arg4[%c0_4, %c0_5] : memref<8x8xf32, #tpu.memory_space<vmem>>, vector<8x8xf32>
    %cst = arith.constant dense<0.000000e+00> : vector<8x256xf32>
    %4 = tpu.matmul %3, %2, %cst {dimension_numbers = #tpu.dot_dimension_numbers<[1], [0], [0], [1], [0, 0, 1, 1], [], []>} : vector<8x8xf32>, vector<8x256xf32>, vector<8x256xf32> -> vector<8x256xf32>
    %c0_6 = arith.constant 0 : index
    %c0_7 = arith.constant 0 : index
    %5 = vector.load %arg5[%c0_6, %c0_7] : memref<8x8xf32, #tpu.memory_space<vmem>>, vector<8x8xf32>
    %c0_8 = arith.constant 0 : index
    %c0_9 = arith.constant 0 : index
    %c0_10 = arith.constant 0 : index
    %6 = vector.load %arg3[%c0_8, %c0_9, %c0_10] : memref<1x8x256xf32, #tpu.memory_space<vmem>>, vector<1x8x256xf32>
    %7 = vector.shape_cast %6 : vector<1x8x256xf32> to vector<8x256xf32>
    %cst_11 = arith.constant dense<0.000000e+00> : vector<8x256xf32>
    %8 = tpu.matmul %5, %7, %cst_11 {dimension_numbers = #tpu.dot_dimension_numbers<[1], [0], [0], [1], [0, 0, 1, 1], [], []>} : vector<8x8xf32>, vector<8x256xf32>, vector<8x256xf32> -> vector<8x256xf32>
    %9 = arith.addf %4, %8 : vector<8x256xf32>
    %10 = vector.broadcast %0 : vector<8x1xf32> to vector<8x256xf32>
    %11 = arith.addf %9, %10 : vector<8x256xf32>
    %12 = arith.addf %11, %2 : vector<8x256xf32>
    %cst_12 = arith.constant 0.000000e+00 : f32
    %13 = vector.broadcast %cst_12 : f32 to vector<8x256xf32>
    %14 = arith.maximumf %12, %13 : vector<8x256xf32>
    %c0_13 = arith.constant 0 : index
    %c0_14 = arith.constant 0 : index
    %c0_15 = arith.constant 0 : index
    %15 = vector.load %arg7[%c0_13, %c0_14, %c0_15] : memref<1x8x256xf32, #tpu.memory_space<vmem>>, vector<1x8x256xf32>
    %16 = vector.shape_cast %15 : vector<1x8x256xf32> to vector<8x256xf32>
    %17 = vector.shape_cast %14 : vector<8x256xf32> to vector<1x8x256xf32>
    tpu.vector_store %arg7[%c0_13, %c0_14, %c0_15], %17 {strides = array<i32>} : memref<1x8x256xf32, #tpu.memory_space<vmem>>, vector<1x8x256xf32>,
    return
  }
  func.func @transform_0(%arg0: i32, %arg1: i32) -> (i32, i32, i32) {
    %c0_i32 = arith.constant 0 : i32
    %c0_i32_0 = arith.constant 0 : i32
    return %arg0, %c0_i32, %arg1 : i32, i32, i32
  }
  func.func @transform_1(%arg0: i32, %arg1: i32) -> (i32, i32, i32) {
    %c0_i32 = arith.constant 0 : i32
    %c0_i32_0 = arith.constant 0 : i32
    return %arg0, %c0_i32, %arg1 : i32, i32, i32
  }
  func.func @transform_2(%arg0: i32, %arg1: i32) -> (i32, i32) {
    %c0_i32 = arith.constant 0 : i32
    %c0_i32_0 = arith.constant 0 : i32
    %c0_i32_1 = arith.constant 0 : i32
    return %c0_i32, %c0_i32_0 : i32, i32
  }
  func.func @transform_3(%arg0: i32, %arg1: i32) -> (i32, i32) {
    %c0_i32 = arith.constant 0 : i32
    %c0_i32_0 = arith.constant 0 : i32
    %c0_i32_1 = arith.constant 0 : i32
    return %c0_i32, %c0_i32_0 : i32, i32
  }
  func.func @transform_4(%arg0: i32, %arg1: i32) -> (i32, i32) {
    %c0_i32 = arith.constant 0 : i32
    %c0_i32_0 = arith.constant 0 : i32
    %c0_i32_1 = arith.constant 0 : i32
    return %c0_i32, %c0_i32_0 : i32, i32
  }
  func.func @transform_5(%arg0: i32, %arg1: i32) -> (i32, i32, i32) {
    %c0_i32 = arith.constant 0 : i32
    %c0_i32_0 = arith.constant 0 : i32
    return %arg0, %c0_i32, %arg1 : i32, i32, i32
  }
}

</mosaic_0001>

<bundles_post_ra>
// kernel: tpu_custom_call.1
= control target key start
LH: loop header
LB: loop body
LE: loop exit
PB: predicated region body
PF: predicated region fallthrough
CT: control target
= control target key end

     0   :  { %s1054_s0 = inlined_call_operand.hbm [shape: f32[2,8,256], index: 0, kind: input, shape index: {}]   ;;  %s1055_s1 = inlined_call_operand.hbm [shape: f32[2,8,256], index: 1, kind: input, shape index: {}]   ;;  %s1056_s2 = inlined_call_operand.vmem [shape: f32[8,8], index: 2, kind: input, shape index: {}]   ;;  %s1057_s3 = inlined_call_operand.hbm [shape: f32[8,8], index: 3, kind: input, shape index: {}]   ;;  %s1058_s4 = inlined_call_operand.vmem [shape: f32[8,1], index: 4, kind: input, shape index: {}]   ;;  %s1059_s5 = inlined_call_operand.hbm [shape: f32[2,8,256], index: 5, kind: output, shape index: {}]  }
   0x1   :  { %1064 = sst [smem:[#allocation18_spill]] %s1057_s3 }
   0x2   :  { %10 = vsyncpa [#allocation3], 0 }
   0x3   :  { %12 = vsyncpa [#allocation3 + $0x1], 0 }
   0x4   :  { %13 = vsyncpa [#allocation6], 0 }
   0x5   :  { %15 = vsyncpa [#allocation6 + $0x1], 0 }
   0x6   :  { %16 = vsyncpa [#allocation4], 0 }
   0x7   :  { %18 = vsyncpa [#allocation4 + $0x1], 0  ;;  %s889_s18 = smov 0   ;;  %s891_s19 = smov 0  }
   0x8   :  { %s893_s20 = smov 0   ;;  %s895_s21 = smov 0  }
   0x9   :  { %s897_s22 = smov 0   ;;  %s899_s23 = smov 0  }
   0xa LB: > { %1065 = sst [smem:[#allocation13_spill]] %s835_s18  ;;  %s920_s24 = sadd.s32 4294967295, %s855_s23   ;;  %s855_s23 = sphi %s899_s23, %s24_s23   ;;  %s851_s22 = sphi %s897_s22, %s1080_s22   ;;  %s847_s21 = sphi %s895_s21, %s1079_s21   ;;  %s843_s20 = sphi %s893_s20, %s1083_s20   ;;  %s839_s19 = sphi %s891_s19, %s1082_s19   ;;  %s835_s18 = sphi %s889_s18, %s1081_s18  }
   0xb   : > { %1066 = sst [smem:[#allocation14_spill]] %s851_s22  ;;  %s568_s25 = sadd.s32 4294967294, %s855_s23  }
   0xc   : > { %p58_p0 = scmp.ne.s32.totalorder %s839_s19, %s835_s18  ;;  %p59_p1 = scmp.eq.s32.totalorder %s920_s24, 0 }
   0xd   : > { %p175_p2 = scmp.eq.s32.totalorder %s920_s24, 1  ;;  %p181_p3 = scmp.eq.s32.totalorder %s568_s25, 1 }
   0xe   : > { %p929_p4 = por %p59_p1, %p58_p0  ;;  %p569_p5 = scmp.ge.s32.totalorder %s855_s23, 1 }
   0xf   : > { %p934_p6 = por %p181_p3, %p58_p0  ;;  %p188_p7 = scmp.lt.s32.totalorder %s855_s23, 3 }
  0x10   : > { %s1070_s3 = sld [smem:[#allocation18_spill]]  ;;  %p571_p9 = scmp.ge.s32.totalorder %s855_s23, 2 }
  0x11   : > { %s1068_s27 = scalar_select %p934_p6, 1, 0 }
  0x12   : > { %p942_p8 = pnand %p569_p5, %p188_p7  ;;  %s857_s7 = smov [#allocation7]  }
  0x13   : > { %1069 = sst [smem:[#allocation15_spill]] %s1068_s27  ;;  %s205_s8 = sshll.u32 %s857_s7, 4  ;;  %s206_s8 = int_to_ptr.vmem [resolvable:$true] %s205_s8 }
  0x14   : > { %p605_p10 = pneg %p942_p8  ;;  %s36_s9 = sadd.s32 1, %s851_s22 }
  0x15   : > { %p38_p12 = scmp.ge.s32.totalorder %s36_s9, 2  ;;  %s45_s10 = sadd.s32 1, %s843_s20 }
  0x16   : > { %s203_s30 = sshll.u32 %s1070_s3, 4  ;;  %p606_p11 = pnand %p605_p10, %p59_p1  ;;  %s204_s30 = int_to_ptr.hbm [resolvable:$true] %s203_s30 }
  0x17   : > { %p52_p13 = scmp.ne.s32.totalorder %s843_s20, %s839_s19  ;;  %p53_p0 = scmp.eq.s32.totalorder %s855_s23, 0 }
  0x18   : > { %608 = dma.hbm_to_vmem [thread:$0]  (!%p606_p11), %s204_s30, 128, %s206_s8, [#allocation6]  }
  0x19   : > { %s1085_s9 = smov (%p38_p12, %s36_s9), 0  ;;  %p958_p3 = por %p53_p0, %p52_p13 }
  0x1a   : > { %1072 = sst [smem:[#allocation16_spill]] %s1085_s9  ;;  %p964_p5 = por %p175_p2, %p52_p13 }
  0x1b   : > { %s40_s13 = ssub.s32 %s851_s22, %s1085_s9  ;;  %p621_p7 = scmp.lt.s32.totalorder %s855_s23, 2 }
  0x1c   : > { %p43_p10 = scmp.eq.s32.totalorder %s40_s13, 0  ;;  %s219_s14 = sand.u32 1, %s843_s20  }
  0x1d   : > { %s572_s15 = sshll.u32 %s219_s14, 4  ;;  %s592_s17 = sshll.u32 %s851_s22, 4 }
  0x1e   : > { %s973_s16 = scalar_select %p43_p10, %s843_s20, %s45_s10  }
  0x1f   : > { %s230_s29 = scalar_lea.hbm %s1054_s0, %s592_s17  ;;  %s223_s30 = scalar_lea.vmem [#allocation2], %s572_s15 }
  0x20   : > { %1075 = sst [smem:[#allocation17_spill]] %s973_s16  ;;  %s234_s7 = sshll.u32 %s223_s30, 4  ;;  %s235_s7 = int_to_ptr.vmem [resolvable:$true] %s234_s7 }
  0x21   : > { %s232_s8 = sshll.u32 %s230_s29, 4  ;;  %p610_p2 = pnand %p621_p7, %p958_p3  ;;  %s233_s8 = int_to_ptr.hbm [resolvable:$true] %s232_s8 }
  0x22   : > { %s252_s13 = scalar_lea.hbm %s1055_s1, %s592_s17  ;;  %s241_s27 = sand.u32 1, %s855_s23  }
  0x23   : > { %s220_s18 = scalar_lea.sflag [#allocation3], %s219_s14  ;;  %s254_s10 = sshll.u32 %s252_s13, 4  ;;  %s255_s10 = int_to_ptr.hbm [resolvable:$true] %s254_s10 }
  0x24   : > { %612 = dma.hbm_to_vmem [thread:$0]  (!%p610_p2), %s233_s8, 256, %s235_s7, %s220_s18  }
  0x25   : > { %s245_s22 = scalar_lea.vmem [#allocation5], %s572_s15  ;;  %s242_s25 = scalar_lea.sflag [#allocation6], %s241_s27 }
  0x26   : > { %s256_s16 = sshll.u32 %s245_s22, 4  ;;  %265 = sbr.rel (%p942_p8) target bundleno = 195 (0xc3), region = 40  ;;  %s257_s16 = int_to_ptr.vmem [resolvable:$true] %s256_s16 }
  0x27   : > { %615 = dma.hbm_to_vmem [thread:$0]  (!%p610_p2), %s255_s10, 256, %s257_s16, %s242_s25  }
  0x28   : > { %s988_s11 = sand.u32 (!%p942_p8), 1, %s839_s19  }
  0x29   : > { %s991_s3 = sshll.u32 (!%p942_p8), %s988_s11, 4  ;;  %s268_s18 = scalar_lea.sflag (!%p942_p8), [#allocation3], %s988_s11 }
  0x2a   : > { %s271_s9 = scalar_lea.vmem (!%p942_p8), [#allocation2], %s991_s3 }
  0x2b   : > { %818 = dma.done.wait (%p929_p4), %s268_s18, 256  }
  0x2c   : > { %820 = vsyncadd (%p929_p4), %s268_s18, 4294967040  ;;  %s277_s22 = sand.u32 1, %s920_s24   ;;  %s281_s6 = scalar_lea.vmem [#allocation5], %s991_s3 }
  0x2d   : > { %s278_s27 = scalar_lea.sflag [#allocation6], %s277_s22 }
  0x2e   : > { %822 = dma.done.wait (%p929_p4), %s278_s27, 256  }
  0x2f   : > { %824 = vsyncadd (%p929_p4), %s278_s27, 4294967040 }
  0x30   : > { %826 = dma.done.wait (%p59_p1), [#allocation6], 128  }
  0x31   : > { %828 = vsyncadd (%p59_p1), [#allocation6], 4294967168  ;;  %v858_v0 = vmov 0   ;;  %vm329_vm0 = vcmask 64512   ;;  %v323_v1 = vld [vmem:[%s271_s9] sm:$0xff]  ;;  %v324_v2 = vld [vmem:[%s271_s9 + $0x8] sm:$0xff] }
  0x32   : > { %674 = vset.pattern.permute.xlu0 %v858_v0  ;;  %v325_v3 = vld [vmem:[%s1056_s2] sm:$0xff]  ;;  %391 = vmatpush.msra.mxu2 %v323_v1  ;;  %v328_v5 = vld [vmem:[%s281_s6 + $0x8] sm:$0xff]  ;;  %s594_s16 = sshll.u32 %s847_s21, 4  ;;  %s318_s30 = scalar_lea.vmem [#allocation8], %s991_s3 }
  0x33   : > { %411 = vmatpush.msra.mxu3 %v324_v2  ;;  %v327_v4 = vld [vmem:[%s281_s6] sm:$0xff]  ;;  %585 = vmatmul.msk.f32.vlgmr.msra.gmra.mxu2 %vm329_vm0, %v325_v3  ;;  %s443_s29 = scalar_lea.hbm %s1059_s5, %s594_s16  ;;  %s445_s7 = sshll.u32 %s318_s30, 4  ;;  %s446_s7 = int_to_ptr.vmem [resolvable:$true] %s445_s7 }
  0x34   : > { %v326_v6 = vld [vmem:[#allocation7] sm:$0xff]  ;;  %586 = vmatmul.msk.f32.vlgmr.msra.gmra.mxu3 %vm329_vm0, %v325_v3  ;;  %348 = vmatpush.msra.mxu0 %v327_v4  ;;  %s447_s8 = sshll.u32 %s443_s29, 4  ;;  %s430_s21 = scalar_lea.sflag [#allocation4], %s988_s11  ;;  %s448_s8 = int_to_ptr.hbm [resolvable:$true] %s447_s8 }
  0x35   : > { %v322_v7 = vld [vmem:[%s1058_s4] sm:$0xff]  ;;  %368 = vmatpush.msra.mxu1 %v328_v5  ;;  %583 = vmatmul.msk.f32.vlgmr.msra.gmra.mxu0 %vm329_vm0, %v326_v6  ;;  %s779_s13 = sshra.s32 %s448_s8, 4  ;;  %s785_s3 = scalar_lea.hbm %s1059_s5, 32  ;;  %s780_s13 = int_to_ptr.hbm [resolvable:$true] %s779_s13 }
  0x36   : > { %584 = vmatmul.msk.f32.vlgmr.msra.gmra.mxu1 %vm329_vm0, %v326_v6  ;;  %418 = vperm.xlu0 %674, %v322_v7   ;;  %s781_s10 = scalar_lea.hbm %s780_s13, 16  ;;  %p786_p11 = scmp.lt.s32.totalorder %s780_s13, %s1059_s5 }
  0x37   : > { %p782_p1 = scmp.ne.s32.totalorder %s780_s13, %s781_s10  ;;  %p787_p12 = scmp.lt.s32.totalorder %s785_s3, %s781_s10 }
  0x39   : > { %p783_p4 = pnand %p782_p1, %p964_p5  ;;  %p788_p13 = por %p787_p12, %p786_p11 }
  0x3b   : > { %p784_p8 = pneg %p783_p4 }
  0x3d   : > { %p789_p0 = pnand %p788_p13, %p784_p8 }
  0xa8   : > { %v419_v10 = vpop.permute.xlu0 %418 }
  0xb2   : > { %v350_v8 = vpop.f32.mrf.mxu0 }
  0xb3   : > { %v370_v9 = vpop.f32.mrf.mxu1 }
  0xb6   : > { %v393_v11 = vpop.f32.mrf.mxu2 }
  0xb7   : > { %v413_v12 = vpop.f32.mrf.mxu3  ;;  %v394_v13 = vadd.f32 %v393_v11, %v350_v8 }
  0xb8   : > { %v414_v14 = vadd.f32 %v413_v12, %v370_v9 }
  0xb9   : > { %v421_v15 = vadd.f32 %v419_v10, %v394_v13 }
  0xba   : > { %v422_v16 = vadd.f32 %v419_v10, %v414_v14 }
  0xbb   : > { %v423_v17 = vadd.f32 %v421_v15, %v323_v1 }
  0xbc   : > { %v424_v18 = vadd.f32 %v422_v16, %v324_v2 }
  0xbd   : > { %v425_v19 = vmax.f32 %v423_v17, 0.0 }
  0xbe   : > { %v426_v20 = vmax.f32 %v424_v18, 0.0 }
  0xbf   : > { %427 = vst [vmem:[%s318_s30] sm:$0xff] %v425_v19 }
  0xc0   : > { %428 = vst [vmem:[%s318_s30 + $0x8] sm:$0xff] %v426_v20 }
  0xc1   : > { %792 = shalt.err (!%p789_p0)
}
  0xc2   : > { %603 = dma.vmem_to_hbm [thread:$0]  (%p964_p5), %s446_s7, 256, %s448_s8, %s430_s21  }
  0xc3 PF: > { %s1076_s11 = sld [smem:[#allocation13_spill]]  ;;  %p617_p3 = pnand %p571_p9, %p934_p6 }
  0xc5   : > { %p618_p7 = pneg %p617_p3 }
  0xc9   : > { %s459_s6 = sand.u32 1, %s1076_s11  }
  0xca   : > { %s460_s14 = scalar_lea.sflag [#allocation4], %s459_s6 }
  0xcb   : > { %830 = dma.done.wait (%p618_p7), %s460_s14, 256  }
  0xcc   : > { %832 = vsyncadd (%p618_p7), %s460_s14, 4294967040  ;;  %s24_s23 = sadd.s32 1, %s855_s23   ;;  %s1078_s15 = sld [smem:[#allocation17_spill]] }
  0xcd   : > { %p21_p10 = scmp.ge.s32.totalorder %s24_s23, 4   ;;  %s1079_s21 = sld [smem:[#allocation14_spill]] }
  0xce   : > { %s1080_s22 = sld [smem:[#allocation16_spill]]  ;;  %s1081_s18 = smov %s839_s19 }
  0xcf   : > { %s1082_s19 = smov %s843_s20  ;;  %23 = sbr.rel (!%p21_p10) target bundleno = 10 (0xa), region = 102 }
  0xd2   : > { %s1083_s20 = smov %s1078_s15 }
  0xd4   :  { %466 = vsyncpa [#allocation3], 1 }
  0xd5   :  { %468 = vsyncpa [#allocation3 + $0x1], 1 }
  0xd6   :  { %469 = vsyncpa [#allocation6], 1 }
  0xd7   :  { %471 = vsyncpa [#allocation6 + $0x1], 1 }
  0xd8   :  { %472 = vsyncpa [#allocation4], 1 }
  0xd9   :  { %474 = vsyncpa [#allocation4 + $0x1], 1 }

</bundles_post_ra>
